<compile_context>
chip_gen: v7x
topology: tpu7x:2x2x1
jax: 0.10.0
libtpu: 0.0.40
codegen_flags: <defaults>
</compile_context>

<pallas_src>
import jax
import jax.numpy as jnp
from jax import lax
from jax.experimental import pallas as pl
from jax.experimental.pallas import tpu as pltpu


# ----------------------------------------------------------------------------
# Kernel
# ----------------------------------------------------------------------------
def _self_attn_kernel(gamma_ref,     # SMEM (1, 1) f32
                      x_ref,         # VMEM (1, C, TQ) f32   residual / query input tile
                      k_ref,         # VMEM (1, C8, N) bf16  lane-dense keys (resident per batch)
                      v_ref,         # VMEM (1, C, N)  bf16  lane-dense values (resident per batch)
                      wq_ref,        # VMEM (C, C8) bf16
                      bq_ref,        # VMEM (1, C8) f32
                      out_ref,       # VMEM (1, C, TQ) f32
                      *attn_refs):   # optional VMEM (1, TQ, N) bf16/f32
    x_tile = x_ref[0]                                               # (C, TQ) f32

    # Query projection for this tile: (TQ, C8) = x_tile^T @ Wq (+ bias).
    q = lax.dot_general(x_tile.astype(jnp.bfloat16), wq_ref[...],
                        dimension_numbers=(((0,), (0,)), ((), ())),
                        preferred_element_type=jnp.float32) + bq_ref[...]

    # energy = q @ k : (TQ, N); keys are already lane-dense (C8, N).
    energy = jnp.dot(q.astype(jnp.bfloat16), k_ref[0],
                     preferred_element_type=jnp.float32)

    # Row-softmax over keys (f32 elementwise math).
    m = jnp.max(energy, axis=-1, keepdims=True)
    p = jnp.exp(energy - m)                                         # (TQ, N) f32
    denom = jnp.sum(p, axis=-1, keepdims=True)                      # (TQ, 1)
    inv = pl.reciprocal(denom, approx=False)                        # exact; tiny (TQ, 1)

    if attn_refs:
        # Attention map is a kernel output: normalize + cast once, reuse the
        # same tile for both the HBM store and the PV matmul.
        attn_ref, = attn_refs
        attn_out = (p * inv).astype(attn_ref.dtype)                 # (TQ, N)
        attn_ref[0] = attn_out
        p_mm = attn_out if attn_ref.dtype == jnp.bfloat16 \
            else attn_out.astype(jnp.bfloat16)
        o_t = lax.dot_general(v_ref[0], p_mm,
                              dimension_numbers=(((1,), (1,)), ((), ())),
                              preferred_element_type=jnp.float32)   # (C, TQ)
    else:
        # No attention output requested: fold the softmax denominator into the
        # PV result (scale the TQ output columns) instead of scaling the full
        # (TQ, N) probability matrix.
        o_un = lax.dot_general(v_ref[0], p.astype(jnp.bfloat16),
                               dimension_numbers=(((1,), (1,)), ((), ())),
                               preferred_element_type=jnp.float32)  # (C, TQ)
        o_t = o_un * jnp.transpose(inv)                             # (1, TQ) column scale

    out_ref[0] = gamma_ref[0, 0] * o_t + x_tile


# ----------------------------------------------------------------------------
# VMEM sizing helpers
# ----------------------------------------------------------------------------
def _vmem_capacity_bytes():
    try:
        return int(pltpu.get_tpu_info().vmem_capacity_bytes)
    except Exception:
        return 64 * 1024 * 1024   # conservative fallback: v7x per-TC VMEM


def _vmem_bytes(C, C8, N, tq, attn_bytes, with_attn):
    """Rough per-step VMEM working set (double-buffered pallas blocks + temps)."""
    dbl = 2
    total = 0
    total += dbl * C * tq * 4                 # x tile (f32)
    total += dbl * C8 * N * 2                 # keys (bf16), resident per batch
    total += dbl * C * N * 2                  # values (bf16), resident per batch
    total += dbl * (C * C8 * 2 + C8 * 4)      # wq (bf16) + bq (f32)
    total += dbl * C * tq * 4                 # out tile (f32)
    if with_attn:
        total += dbl * tq * N * attn_bytes    # attention tile
    total += 3 * tq * N * 4                   # in-kernel f32 temporaries (energy/p/attn)
    return total


def _pick_tq(N, C, C8, attn_bytes, with_attn, vmem_cap):
    budget = int(0.55 * vmem_cap)
    for t in (512, 256, 128):                 # v6e/v5e reach 512; v7x falls back
        if N % t == 0 and _vmem_bytes(C, C8, N, t, attn_bytes, with_attn) <= budget:
            return t
    if N % 128 == 0:
        return 128
    return N                                  # small / odd spatial sizes: one tile


# ----------------------------------------------------------------------------
# Wrapper
# ----------------------------------------------------------------------------
def self_attn_forward(x_nchw, wq, bq, wk, bk, wv, bv, gamma, *,
                      tq=None, return_attention=True, attn_dtype=jnp.bfloat16):
    """x_nchw: (B, C, W, H) f32.  Weights in matmul form (C_in, C_out),
    biases (1, C_out), gamma (1, 1).
    Returns (out (B,C,W,H), attention (B,N,N)) or just `out` if
    return_attention=False."""
    B, C, W, H = x_nchw.shape
    N = W * H
    C8 = wq.shape[1]
    attn_bytes = jnp.dtype(attn_dtype).itemsize

    vmem_cap = _vmem_capacity_bytes()
    if tq is None:
        tq = _pick_tq(N, C, C8, attn_bytes, return_attention, vmem_cap)
    assert N % tq == 0, "query tile size must divide N = W*H"

    x_cn = x_nchw.reshape(B, C, N)                      # free reshape, natural layout
    x_bf = x_cn.astype(jnp.bfloat16)
    wq_bf = wq.astype(jnp.bfloat16)
    wk_bf = wk.astype(jnp.bfloat16)
    wv_bf = wv.astype(jnp.bfloat16)

    # Hoisted key/value projections (plain XLA einsums; bf16 MXU operands with
    # f32 accumulation), produced directly in lane-dense (·, N) layout so the
    # kernel never holds lane-sparse tiles and the query-tile grid axis
    # carries no scratch state (-> fully parallel, megacore-friendly).
    k = jnp.einsum('co,bcn->bon', wk_bf, x_bf,
                   preferred_element_type=jnp.float32) + bk.reshape(1, C8, 1)
    v = jnp.einsum('co,bcn->bon', wv_bf, x_bf,
                   preferred_element_type=jnp.float32) + bv.reshape(1, C, 1)
    k_bf = k.astype(jnp.bfloat16)                       # (B, C8, N)
    v_bf = v.astype(jnp.bfloat16)                       # (B, C, N)

    need = _vmem_bytes(C, C8, N, tq, attn_bytes, return_attention)
    vmem_limit = min(max(int(1.5 * need) + (8 << 20), 32 << 20),
                     int(0.85 * vmem_cap))

    in_specs = [
        pl.BlockSpec(memory_space=pltpu.MemorySpace.SMEM),            # gamma
        pl.BlockSpec((1, C, tq), lambda b, qi: (b, 0, qi)),           # x tile
        pl.BlockSpec((1, C8, N), lambda b, qi: (b, 0, 0)),            # k (resident per b)
        pl.BlockSpec((1, C, N),  lambda b, qi: (b, 0, 0)),            # v (resident per b)
        pl.BlockSpec((C, C8),    lambda b, qi: (0, 0)),               # wq
        pl.BlockSpec((1, C8),    lambda b, qi: (0, 0)),               # bq
    ]
    out_spec_x = pl.BlockSpec((1, C, tq), lambda b, qi: (b, 0, qi))
    if return_attention:
        out_shape = (jax.ShapeDtypeStruct((B, C, N), jnp.float32),
                     jax.ShapeDtypeStruct((B, N, N), attn_dtype))
        out_specs = (out_spec_x,
                     pl.BlockSpec((1, tq, N), lambda b, qi: (b, qi, 0)))
    else:
        out_shape = jax.ShapeDtypeStruct((B, C, N), jnp.float32)
        out_specs = out_spec_x

    result = pl.pallas_call(
        _self_attn_kernel,
        out_shape=out_shape,
        grid=(B, N // tq),
        in_specs=in_specs,
        out_specs=out_specs,
        compiler_params=pltpu.CompilerParams(
            dimension_semantics=("parallel", "parallel"),
            vmem_limit_bytes=int(vmem_limit)),
    )(gamma, x_cn, k_bf, v_bf, wq_bf, bq)

    if return_attention:
        out_cn, attn = result
        return out_cn.reshape(B, C, W, H), attn
    return result.reshape(B, C, W, H)


# ----------------------------------------------------------------------------
# Pure-JAX reference (mirrors the PyTorch module forward)
# ----------------------------------------------------------------------------
def _reference(x_nchw, wq, bq, wk, bk, wv, bv, gamma):
    B, C, W, H = x_nchw.shape
    N = W * H
    x_nc = jnp.transpose(x_nchw.reshape(B, C, N), (0, 2, 1))
    q = x_nc @ wq + bq
    k = x_nc @ wk + bk
    v = x_nc @ wv + bv
    energy = jnp.einsum('bic,bjc->bij', q, k)
    attn = jax.nn.softmax(energy, axis=-1)
    o = jnp.einsum('bij,bjc->bic', attn, v)
    out_nc = gamma[0, 0] * o + x_nc
    out = jnp.transpose(out_nc, (0, 2, 1)).reshape(B, C, W, H)
    return out, attn


if __name__ == "__main__":
    # in_dim must be >= 8 (module uses in_dim // 8 channels for q/k).
    B, C, W, H = 2, 16, 16, 16          # N = 256 tokens, C8 = 2
    C8 = C // 8

    key = jax.random.PRNGKey(0)
    kx, kwq, kbq, kwk, kbk, kwv, kbv = jax.random.split(key, 7)

    x = jax.random.normal(kx, (B, C, W, H), dtype=jnp.float32)

    # Conv2d(k=1) weights (C_out, C_in, 1, 1) stored directly in matmul form
    # (C_in, C_out); biases as (1, C_out).
    wq = jax.random.normal(kwq, (C, C8), dtype=jnp.float32) * 0.1
    bq = jax.random.normal(kbq, (1, C8), dtype=jnp.float32) * 0.1
    wk = jax.random.normal(kwk, (C, C8), dtype=jnp.float32) * 0.1
    bk = jax.random.normal(kbk, (1, C8), dtype=jnp.float32) * 0.1
    wv = jax.random.normal(kwv, (C, C), dtype=jnp.float32) * 0.1
    bv = jax.random.normal(kbv, (1, C), dtype=jnp.float32) * 0.1
    # gamma is zero-initialized in the module; use a nonzero value so the
    # attention branch contributes to the output under test.
    gamma = jnp.full((1, 1), 0.5, dtype=jnp.float32)

    # tq=128 -> 2 query tiles per batch element, exercising the tiled path and
    # the (default) bf16 attention-map writeback.
    out, attn = self_attn_forward(x, wq, bq, wk, bk, wv, bv, gamma, tq=128)
    jax.block_until_ready((out, attn))

    # Also exercise the attention-free path (folded softmax denominator).
    out_noattn = self_attn_forward(x, wq, bq, wk, bk, wv, bv, gamma,
                                   return_attention=False)
    jax.block_until_ready(out_noattn)

    ref_out, ref_attn = _reference(x, wq, bq, wk, bk, wv, bv, gamma)

    assert out.shape == (B, C, W, H) and attn.shape == (B, W * H, W * H)
    attn_f32 = attn.astype(jnp.float32)
    # bf16 MXU operands + bf16 attention writeback -> loosened tolerances.
    assert jnp.allclose(attn_f32, ref_attn, atol=5e-3, rtol=5e-2)
    assert jnp.allclose(out, ref_out, atol=2e-2, rtol=2e-2)
    assert jnp.allclose(out_noattn, ref_out, atol=2e-2, rtol=2e-2)
    assert jnp.allclose(jnp.sum(attn_f32, axis=-1), 1.0, atol=1e-2)

    print("KERNEL_OK")
</pallas_src>

<mosaic_0001>
module attributes {stable_mosaic.version = 11 : i64} {
  func.func @_self_attn_kernel(%arg0: i32, %arg1: i32, %arg2: memref<1x1xf32, #tpu.memory_space<smem>>, %arg3: memref<1x16x128xf32, #tpu.memory_space<vmem>>, %arg4: memref<1x2x256xbf16, #tpu.memory_space<vmem>>, %arg5: memref<1x16x256xbf16, #tpu.memory_space<vmem>>, %arg6: memref<16x2xbf16, #tpu.memory_space<vmem>>, %arg7: memref<1x2xf32, #tpu.memory_space<vmem>>, %arg8: memref<1x16x128xf32, #tpu.memory_space<vmem>>, %arg9: memref<1x128x256xbf16, #tpu.memory_space<vmem>>) attributes {dimension_semantics = [#tpu.dimension_semantics<parallel>, #tpu.dimension_semantics<parallel>], iteration_bounds = array<i64: 2, 2>, scalar_prefetch = 0 : i64, scratch_operands = 0 : i64, tpu.core_type = #tpu.core_type<tc>, window_params = [{transform_indices = @transform_0, window_bounds = array<i64: 1, 1>}, {transform_indices = @transform_1, window_bounds = array<i64: 1, 16, 128>}, {transform_indices = @transform_2, window_bounds = array<i64: 1, 2, 256>}, {transform_indices = @transform_3, window_bounds = array<i64: 1, 16, 256>}, {pipeline_mode = #tpu.pipeline_mode<synchronous>, transform_indices = @transform_4, window_bounds = array<i64: 16, 2>}, {pipeline_mode = #tpu.pipeline_mode<synchronous>, transform_indices = @transform_5, window_bounds = array<i64: 1, 2>}, {transform_indices = @transform_6, window_bounds = array<i64: 1, 16, 128>}, {transform_indices = @transform_7, window_bounds = array<i64: 1, 128, 256>}]} {
    %c0 = arith.constant 0 : index
    %c0_0 = arith.constant 0 : index
    %c0_1 = arith.constant 0 : index
    %0 = vector.load %arg3[%c0, %c0_0, %c0_1] : memref<1x16x128xf32, #tpu.memory_space<vmem>>, vector<1x16x128xf32>
    %1 = vector.shape_cast %0 : vector<1x16x128xf32> to vector<16x128xf32>
    %2 = arith.truncf %1 : vector<16x128xf32> to vector<16x128xbf16>
    %c0_2 = arith.constant 0 : index
    %c0_3 = arith.constant 0 : index
    %3 = vector.load %arg6[%c0_2, %c0_3] : memref<16x2xbf16, #tpu.memory_space<vmem>>, vector<16x2xbf16>
    %cst = arith.constant dense<0.000000e+00> : vector<128x2xf32>
    %4 = tpu.matmul %2, %3, %cst {dimension_numbers = #tpu.dot_dimension_numbers<[0], [0], [1], [1], [0, 1, 1, 1], [], []>} : vector<16x128xbf16>, vector<16x2xbf16>, vector<128x2xf32> -> vector<128x2xf32>
    %c0_4 = arith.constant 0 : index
    %c0_5 = arith.constant 0 : index
    %5 = vector.load %arg7[%c0_4, %c0_5] : memref<1x2xf32, #tpu.memory_space<vmem>>, vector<1x2xf32>
    %6 = vector.broadcast %5 : vector<1x2xf32> to vector<128x2xf32>
    %7 = arith.addf %4, %6 : vector<128x2xf32>
    %8 = arith.truncf %7 : vector<128x2xf32> to vector<128x2xbf16>
    %c0_6 = arith.constant 0 : index
    %c0_7 = arith.constant 0 : index
    %c0_8 = arith.constant 0 : index
    %9 = vector.load %arg4[%c0_6, %c0_7, %c0_8] : memref<1x2x256xbf16, #tpu.memory_space<vmem>>, vector<1x2x256xbf16>
    %10 = vector.shape_cast %9 : vector<1x2x256xbf16> to vector<2x256xbf16>
    %cst_9 = arith.constant dense<0.000000e+00> : vector<128x256xf32>
    %11 = tpu.matmul %8, %10, %cst_9 {dimension_numbers = #tpu.dot_dimension_numbers<[1], [0], [0], [1], [0, 0, 1, 1], [], []>} : vector<128x2xbf16>, vector<2x256xbf16>, vector<128x256xf32> -> vector<128x256xf32>
    %cst_10 = arith.constant dense<0xFF800000> : vector<128xf32>
    %12 = vector.multi_reduction <maximumf>, %11, %cst_10 [1] : vector<128x256xf32> to vector<128xf32>
    %13 = vector.shape_cast %12 : vector<128xf32> to vector<128x1xf32>
    %14 = vector.broadcast %13 : vector<128x1xf32> to vector<128x256xf32>
    %15 = arith.subf %11, %14 : vector<128x256xf32>
    %16 = math.exp %15 : vector<128x256xf32>
    %cst_11 = arith.constant dense<0.000000e+00> : vector<128xf32>
    %17 = vector.multi_reduction <add>, %16, %cst_11 [1] : vector<128x256xf32> to vector<128xf32>
    %18 = vector.shape_cast %17 : vector<128xf32> to vector<128x1xf32>
    %19 = tpu.reciprocal %18 : vector<128x1xf32> -> vector<128x1xf32>
    %20 = vector.broadcast %19 : vector<128x1xf32> to vector<128x256xf32>
    %21 = arith.mulf %16, %20 : vector<128x256xf32>
    %22 = arith.truncf %21 : vector<128x256xf32> to vector<128x256xbf16>
    %c0_12 = arith.constant 0 : index
    %c0_13 = arith.constant 0 : index
    %c0_14 = arith.constant 0 : index
    %23 = vector.load %arg9[%c0_12, %c0_13, %c0_14] : memref<1x128x256xbf16, #tpu.memory_space<vmem>>, vector<1x128x256xbf16>
    %24 = vector.shape_cast %23 : vector<1x128x256xbf16> to vector<128x256xbf16>
    %25 = vector.shape_cast %22 : vector<128x256xbf16> to vector<1x128x256xbf16>
    tpu.vector_store %arg9[%c0_12, %c0_13, %c0_14], %25 {strides = array<i32>} : memref<1x128x256xbf16, #tpu.memory_space<vmem>>, vector<1x128x256xbf16>,
    %c0_15 = arith.constant 0 : index
    %c0_16 = arith.constant 0 : index
    %c0_17 = arith.constant 0 : index
    %26 = vector.load %arg5[%c0_15, %c0_16, %c0_17] : memref<1x16x256xbf16, #tpu.memory_space<vmem>>, vector<1x16x256xbf16>
    %27 = vector.shape_cast %26 : vector<1x16x256xbf16> to vector<16x256xbf16>
    %cst_18 = arith.constant dense<0.000000e+00> : vector<16x128xf32>
    %28 = tpu.matmul %27, %22, %cst_18 {dimension_numbers = #tpu.dot_dimension_numbers<[1], [1], [0], [0], [0, 0, 1, 0], [], []>} : vector<16x256xbf16>, vector<128x256xbf16>, vector<16x128xf32> -> vector<16x128xf32>
    %c0_19 = arith.constant 0 : index
    %c0_20 = arith.constant 0 : index
    %29 = memref.load %arg2[%c0_19, %c0_20] : memref<1x1xf32, #tpu.memory_space<smem>>
    %30 = vector.broadcast %29 : f32 to vector<16x128xf32>
    %31 = arith.mulf %30, %28 : vector<16x128xf32>
    %32 = arith.addf %31, %1 : vector<16x128xf32>
    %c0_21 = arith.constant 0 : index
    %c0_22 = arith.constant 0 : index
    %c0_23 = arith.constant 0 : index
    %33 = vector.load %arg8[%c0_21, %c0_22, %c0_23] : memref<1x16x128xf32, #tpu.memory_space<vmem>>, vector<1x16x128xf32>
    %34 = vector.shape_cast %33 : vector<1x16x128xf32> to vector<16x128xf32>
    %35 = vector.shape_cast %32 : vector<16x128xf32> to vector<1x16x128xf32>
    tpu.vector_store %arg8[%c0_21, %c0_22, %c0_23], %35 {strides = array<i32>} : memref<1x16x128xf32, #tpu.memory_space<vmem>>, vector<1x16x128xf32>,
    return
  }
  func.func @transform_0(%arg0: i32, %arg1: i32) -> (i32, i32) {
    %c0_i32 = arith.constant 0 : i32
    %c0_i32_0 = arith.constant 0 : i32
    %c0_i32_1 = arith.constant 0 : i32
    return %c0_i32, %c0_i32_0 : i32, i32
  }
  func.func @transform_1(%arg0: i32, %arg1: i32) -> (i32, i32, i32) {
    %c0_i32 = arith.constant 0 : i32
    %c0_i32_0 = arith.constant 0 : i32
    return %arg0, %c0_i32, %arg1 : i32, i32, i32
  }
  func.func @transform_2(%arg0: i32, %arg1: i32) -> (i32, i32, i32) {
    %c0_i32 = arith.constant 0 : i32
    %c0_i32_0 = arith.constant 0 : i32
    %c0_i32_1 = arith.constant 0 : i32
    return %arg0, %c0_i32, %c0_i32_0 : i32, i32, i32
  }
  func.func @transform_3(%arg0: i32, %arg1: i32) -> (i32, i32, i32) {
    %c0_i32 = arith.constant 0 : i32
    %c0_i32_0 = arith.constant 0 : i32
    %c0_i32_1 = arith.constant 0 : i32
    return %arg0, %c0_i32, %c0_i32_0 : i32, i32, i32
  }
  func.func @transform_4(%arg0: i32, %arg1: i32) -> (i32, i32) {
    %c0_i32 = arith.constant 0 : i32
    %c0_i32_0 = arith.constant 0 : i32
    %c0_i32_1 = arith.constant 0 : i32
    return %c0_i32, %c0_i32_0 : i32, i32
  }
  func.func @transform_5(%arg0: i32, %arg1: i32) -> (i32, i32) {
    %c0_i32 = arith.constant 0 : i32
    %c0_i32_0 = arith.constant 0 : i32
    %c0_i32_1 = arith.constant 0 : i32
    return %c0_i32, %c0_i32_0 : i32, i32
  }
  func.func @transform_6(%arg0: i32, %arg1: i32) -> (i32, i32, i32) {
    %c0_i32 = arith.constant 0 : i32
    %c0_i32_0 = arith.constant 0 : i32
    return %arg0, %c0_i32, %arg1 : i32, i32, i32
  }
  func.func @transform_7(%arg0: i32, %arg1: i32) -> (i32, i32, i32) {
    %c0_i32 = arith.constant 0 : i32
    %c0_i32_0 = arith.constant 0 : i32
    return %arg0, %arg1, %c0_i32 : i32, i32, i32
  }
}

</mosaic_0001>

<bundles_post_ra>
// kernel: tpu_custom_call.1
= control target key start
LH: loop header
LB: loop body
LE: loop exit
PB: predicated region body
PF: predicated region fallthrough
CT: control target
= control target key end

     0   :  { %s2608_s0 = inlined_call_operand.<no memory space> [shape: f32[1,1], index: 0, kind: input, shape index: {}]   ;;  %s2609_s1 = inlined_call_operand.hbm [shape: f32[2,16,256], index: 1, kind: input, shape index: {}]   ;;  %s2610_s2 = inlined_call_operand.vmem [shape: bf16[2,2,256], index: 2, kind: input, shape index: {}]   ;;  %s2611_s3 = inlined_call_operand.hbm [shape: bf16[2,16,256], index: 3, kind: input, shape index: {}]   ;;  %s2612_s4 = inlined_call_operand.vmem [shape: bf16[16,2], index: 4, kind: input, shape index: {}]   ;;  %s2613_s5 = inlined_call_operand.vmem [shape: f32[1,2], index: 5, kind: input, shape index: {}]   ;;  %s2614_s6 = inlined_call_operand.hbm [shape: f32[2,16,256], index: 6, kind: output, shape index: {0}]   ;;  %s2615_s7 = inlined_call_operand.hbm [shape: bf16[2,256,256], index: 7, kind: output, shape index: {1}]  }
   0x1   :  { %2633 = sst [smem:[#allocation20_spill]] %s2609_s1 }
   0x2   :  { %2634 = sst [smem:[#allocation21_spill]] %s2610_s2 }
   0x3   :  { %2635 = sst [smem:[#allocation22_spill]] %s2611_s3 }
   0x4   :  { %2636 = sst [smem:[#allocation23_spill]] %s2612_s4 }
   0x5   :  { %2637 = sst [smem:[#allocation24_spill]] %s2614_s6 }
   0x6   :  { %2638 = sst [smem:[#allocation25_spill]] %s2615_s7 }
   0x7   :  { %13 = sst [smem:[#allocation2]] %s2608_s0 }
   0x8   :  { %14 = vsyncpa [#allocation4], 0 }
   0x9   :  { %16 = vsyncpa [#allocation4 + $0x1], 0 }
   0xa   :  { %17 = vsyncpa [#allocation7], 0 }
   0xb   :  { %19 = vsyncpa [#allocation7 + $0x1], 0 }
   0xc   :  { %20 = vsyncpa [#allocation5], 0 }
   0xd   :  { %22 = vsyncpa [#allocation5 + $0x1], 0 }
   0xe   :  { %23 = vsyncpa [#allocation10], 0 }
   0xf   :  { %25 = vsyncpa [#allocation10 + $0x1], 0  ;;  %s1936_s26 = smov 0   ;;  %s1938_s27 = smov 0  }
  0x10   :  { %s1940_s28 = smov 0   ;;  %s1942_s29 = smov 0  }
  0x11   :  { %s1944_s30 = smov 0   ;;  %s1946_s8 = smov 0  }
  0x12   :  { %s1948_s0 = smov 0   ;;  %s1950_s9 = smov 0  }
  0x13   :  { %s1952_s10 = smov 0   ;;  %s1954_s11 = smov 0  }
  0x14   :  { %s1956_s12 = smov 0  }
  0x15 LB: > { %2639 = sst [smem:[#allocation15_spill]] %s1863_s0  ;;  %s2616_s13 = sadd.s32 4294967295, %s1879_s12   ;;  %s1879_s12 = sphi %s1956_s12, %s31_s12   ;;  %s1875_s11 = sphi %s1954_s11, %s2686_s11   ;;  %s1871_s10 = sphi %s1952_s10, %s2685_s10   ;;  %s1867_s9 = sphi %s1950_s9, %s2684_s9   ;;  %s1863_s0 = sphi %s1948_s0, %s2683_s0   ;;  %s1859_s8 = sphi %s1946_s8, %s2682_s8   ;;  %s1855_s30 = sphi %s1944_s30, %s2681_s30   ;;  %s1851_s29 = sphi %s1942_s29, %s2680_s29   ;;  %s1847_s28 = sphi %s1940_s28, %s2679_s28   ;;  %s1843_s27 = sphi %s1938_s27, %s2678_s27   ;;  %s1839_s26 = sphi %s1936_s26, %s2677_s26  }
  0x16   : > { %s1331_s14 = sadd.s32 4294967294, %s1879_s12   ;;  %s40_s15 = sadd.s32 1, %s1871_s10 }
  0x17   : > { %s43_s16 = sadd.s32 1, %s1875_s11  ;;  %p41_p0 = scmp.ge.s32.totalorder %s40_s15, 2 }
  0x18   : > { %s73_s17 = sadd.s32 1, %s1859_s8  ;;  %p80_p1 = scmp.ne.s32.totalorder %s1859_s8, %s1855_s30 }
  0x19   : > { %p2626_p2 = scmp.eq.s32.totalorder %s1879_s12, 0  ;;  %s2688_s15 = smov (%p41_p0, %s40_s15), 0 }
  0x1a   : > { %2640 = sst [smem:[#allocation16_spill]] %s2688_s15  ;;  %s2690_s16 = smov (!%p41_p0, %s43_s16), %s1875_s11 }
  0x1b   : > { %s69_s18 = ssub.s32 %s1871_s10, %s2688_s15  ;;  %p2006_p3 = por %p2626_p2, %p80_p1 }
  0x1c   : > { %p45_p4 = scmp.ge.s32.totalorder %s2690_s16, 2  ;;  %p2627_p5 = scmp.ne.s32.totalorder %s1855_s30, %s1851_s29 }
  0x1d   : > { %p206_p6 = scmp.eq.s32.totalorder %s2616_s13, 3  ;;  %p212_p7 = scmp.eq.s32.totalorder %s1331_s14, 3 }
  0x1e   : > { %s2692_s16 = smov (%p45_p4, %s2690_s16), 0  ;;  %p2625_p12 = scmp.lt.s32.totalorder %s1879_s12, 4 }
  0x1f   : > { %2642 = sst [smem:[#allocation17_spill]] %s2692_s16  ;;  %p2016_p8 = por %p206_p6, %p80_p1 }
  0x20   : > { %p2023_p9 = por %p212_p7, %p2627_p5  ;;  %s2029_s22 = ssub.s32 %s1875_s11, %s2692_s16 }
  0x21   : > { %s2643_s20 = scalar_select %p2016_p8, 1, 0 }
  0x22   : > { %s2645_s21 = scalar_select %p2023_p9, 1, 0 }
  0x23   : > { %2644 = sst [smem:[#allocation18_spill]] %s2643_s20  ;;  %s70_s23 = sor.u32 %s69_s18, %s2029_s22 }
  0x24   : > { %2646 = sst [smem:[#allocation19_spill]] %s2645_s21  ;;  %p71_p11 = scmp.eq.s32.totalorder %s70_s23, 0 }
  0x25   : > { %s269_s24 = sand.u32 1, %s1859_s8   ;;  %s1335_s25 = sshll.u32 %s1875_s11, 2 }
  0x26   : > { %s2037_s14 = scalar_select %p71_p11, %s1859_s8, %s73_s17  }
  0x27   : > { %s1334_s13 = sshll.u32 %s269_s24, 4  ;;  %s278_s15 = sadd.s32 %s1871_s10, %s1335_s25 }
  0x28   : > { %s1336_s6 = sshll.u32 %s278_s15, 7  ;;  %s273_s7 = scalar_lea.vmem [#allocation3], %s1334_s13 }
  0x29   : > { %s281_s21 = sshll.u32 %s273_s7, 4  ;;  %s2647_s1 = sld [smem:[#allocation20_spill]]  ;;  %s2045_s21 = int_to_ptr.vmem [resolvable:$true] %s281_s21 }
  0x2a   : > { %p2051_p13 = pnand %p2625_p12, %p2006_p3  ;;  %s2056_s7 = scalar_lea.sflag [#allocation4], %s269_s24 }
  0x2c   : > { %p1663_p4 = pneg %p2051_p13 }
  0x2f   : > { %s2043_s16 = scalar_lea.hbm %s2647_s1, %s1336_s6  ;;  %s1666_s15 = scalar_lea.hbm %s2647_s1, 1024 }
  0x30   : > { %s1661_s0 = scalar_lea.hbm %s2043_s16, 256  ;;  %p1667_p3 = scmp.lt.u32.totalorder %s2043_s16, %s2647_s1 }
  0x31   : > { %p1662_p1 = scmp.ne.s32.totalorder %s2043_s16, %s1661_s0  ;;  %p1668_p11 = scmp.lt.u32.totalorder %s1666_s15, %s1661_s0 }
  0x32   : > { %p1670_p2 = scmp.lt.u32.totalorder %s1661_s0, %s2043_s16 }
  0x33   : > { %p1664_p6 = pnand %p1663_p4, %p1662_p1  ;;  %p1669_p12 = por %p1668_p11, %p1667_p3 }
  0x35   : > { %p1665_p7 = pneg %p1664_p6  ;;  %p1671_p5 = por %p1670_p2, %p1669_p12 }
  0x37   : > { %p1672_p10 = pnand %p1671_p5, %p1665_p7 }
  0x39   : > { %1675 = shalt.err (!%p1672_p10)
}
  0x3a   : > { %s1676_s20 = scalar_lea.vmem %s2045_s21, 256  ;;  %s1881_s23 = smov [#allocation3]  }
  0x3b   : > { %p1677_p1 = scmp.ne.s32.totalorder %s2045_s21, %s1676_s20  ;;  %s1681_s24 = sshll.u32 %s1881_s23, 4  ;;  %s1682_s24 = int_to_ptr.vmem [resolvable:$false] %s1681_s24 }
  0x3c   : > { %s1683_s25 = scalar_lea.vmem %s1682_s24, 512  ;;  %p1684_p9 = scmp.lt.s32.totalorder %s2045_s21, %s1682_s24 }
  0x3d   : > { %p1679_p6 = pnand %p1677_p1, %p1663_p4  ;;  %p1685_p3 = scmp.lt.s32.totalorder %s1683_s25, %s1676_s20 }
  0x3f   : > { %p1680_p0 = pneg %p1679_p6  ;;  %p1686_p11 = por %p1685_p3, %p1684_p9 }
  0x41   : > { %p1687_p2 = pnand %p1686_p11, %p1680_p0 }
  0x43   : > { %1690 = shalt.err (!%p1687_p2)
}
  0x44   : > { %s1882_s0 = smov 256   ;;  %s2628_s6 = smov 128  }
  0x45   : > { %s1884_s13 = smov 8   ;;  %p317_p5 = scmp.lt.s32.totalorder %s1879_s12, 5 }
  0x46   : > { %1450 = dma.hbm_to_vmem [thread:$0]  (!%p2051_p13), %s2043_s16, 256, %s2045_s21, %s2056_s7, %s1882_s0, %s2628_s6, %s1884_s13  }
  0x47   : > { %p2649_p9 = scmp.ge.s32.totalorder %s1879_s12, 1  ;;  %s2651_s18 = sadd.s32 4294967295, %s1879_s12  }
  0x48   : > { %p87_p12 = scmp.eq.s32.totalorder %s2651_s18, 0  ;;  %s125_s19 = sadd.s32 1, %s1847_s28 }
  0x49   : > { %p2089_p10 = pnand %p2649_p9, %p317_p5  ;;  %p2652_p0 = scmp.eq.s32.totalorder %s2029_s22, 0 }
  0x4a   : > { %p2653_p4 = scmp.ne.s32.totalorder %s1855_s30, %s1851_s29  ;;  %p132_p1 = scmp.ne.s32.totalorder %s1847_s28, %s1843_s27 }
  0x4b   : > { %s2099_s20 = scalar_select %p2652_p0, %s1847_s28, %s125_s19  }
  0x4c   : > { %p2104_p7 = por %p87_p12, %p2653_p4  ;;  %p138_p13 = scmp.ne.s32.totalorder %s1843_s27, %s1839_s26 }
  0x4d   : > { %s298_s16 = sand.u32 1, %s1847_s28   ;;  %p2655_p6 = scmp.eq.s32.totalorder %s1879_s12, 0 }
  0x4e   : > { %s2654_s23 = scalar_select %p2104_p7, 1, 0 }
  0x4f   : > { %p134_p3 = por %p132_p1, %p2655_p6  ;;  %p2115_p11 = por %p138_p13, %p87_p12 }
  0x50   : > { %s1337_s17 = sshll.u32 %s298_s16, 4  ;;  %s1394_s7 = sshll.u32 %s1875_s11, 8 }
  0x51   : > { %s2656_s21 = scalar_select %p2115_p11, 1, 0 }
  0x52   : > { %s2657_s3 = sld [smem:[#allocation22_spill]]  ;;  %s302_s0 = scalar_lea.vmem [#allocation6], %s1337_s17 }
  0x53   : > { %s309_s26 = sshll.u32 %s302_s0, 4  ;;  %p2658_p2 = scmp.lt.s32.totalorder %s1879_s12, 4  ;;  %s2125_s26 = int_to_ptr.vmem [resolvable:$true] %s309_s26 }
  0x54   : > { %s2133_s19 = scalar_lea.sflag [#allocation7], %s298_s16 }
  0x55   : > { %p2129_p5 = pnand %p2658_p2, %p134_p3 }
  0x57   : > { %p1693_p12 = pneg %p2129_p5 }
  0x58   : > { %s2123_s25 = scalar_lea.hbm %s2657_s3, %s1394_s7  ;;  %s1696_s22 = scalar_lea.hbm %s2657_s3, 512 }
  0x59   : > { %s1691_s24 = scalar_lea.hbm %s2123_s25, 256  ;;  %p1697_p1 = scmp.lt.u32.totalorder %s2123_s25, %s2657_s3 }
  0x5a   : > { %p1692_p9 = scmp.ne.s32.totalorder %s2123_s25, %s1691_s24  ;;  %p1698_p13 = scmp.lt.u32.totalorder %s1696_s22, %s1691_s24 }
  0x5b   : > { %p1700_p3 = scmp.lt.u32.totalorder %s1691_s24, %s2123_s25 }
  0x5c   : > { %p1694_p0 = pnand %p1693_p12, %p1692_p9  ;;  %p1699_p6 = por %p1698_p13, %p1697_p1 }
  0x5e   : > { %p1695_p4 = pneg %p1694_p0  ;;  %p1701_p2 = por %p1700_p3, %p1699_p6 }
  0x60   : > { %p1702_p8 = pnand %p1701_p2, %p1695_p4 }
  0x62   : > { %1705 = shalt.err (!%p1702_p8)
}
  0x63   : > { %s1706_s16 = scalar_lea.vmem %s2125_s26, 256  ;;  %s1885_s17 = smov [#allocation6]  }
  0x64   : > { %p1707_p9 = scmp.ne.s32.totalorder %s2125_s26, %s1706_s16  ;;  %s1711_s7 = sshll.u32 %s1885_s17, 4  ;;  %s1712_s7 = int_to_ptr.vmem [resolvable:$false] %s1711_s7 }
  0x65   : > { %s1713_s6 = scalar_lea.vmem %s1712_s7, 512  ;;  %p1714_p7 = scmp.lt.s32.totalorder %s2125_s26, %s1712_s7 }
  0x66   : > { %p1709_p0 = pnand %p1707_p9, %p1693_p12  ;;  %p1715_p1 = scmp.lt.s32.totalorder %s1713_s6, %s1706_s16 }
  0x68   : > { %p1710_p11 = pneg %p1709_p0  ;;  %p1716_p13 = por %p1715_p1, %p1714_p7 }
  0x6a   : > { %p1717_p6 = pnand %p1716_p13, %p1710_p11 }
  0x6c   : > { %1720 = shalt.err (!%p1717_p6)
}
  0x6d   : > { %s2660_s24 = smov 128   ;;  %321 = sbr.rel (%p2089_p10) target bundleno = 1283 (0x503), region = 44 }
  0x6e   : > { %1453 = dma.hbm_to_vmem [thread:$0]  (!%p2129_p5), %s2123_s25, 256, %s2125_s26, %s2133_s19, %s2660_s24, %s2660_s24, %s1884_s13  }
  0x6f   : > { %s2167_s22 = sand.u32 (!%p2089_p10), 1, %s1855_s30   ;;  %p2661_p8 = scmp.ne.s32.totalorder (!%p2089_p10), %s2654_s23, 0 }
  0x70   : > { %s2632_s0 = sshll.u32 (!%p2089_p10), %s2167_s22, 4  ;;  %s324_s16 = scalar_lea.sflag (!%p2089_p10), [#allocation4], %s2167_s22 }
  0x71   : > { %s2173_s18 = scalar_lea.vmem (!%p2089_p10), [#allocation3], %s2632_s0 }
  0x74   : > { %1822 = dma.done.wait (%p2661_p8), %s324_s16, 256  }
  0x75   : > { %1824 = vsyncadd (%p2661_p8), %s324_s16, 4294967040  ;;  %s332_s13 = sand.u32 1, %s1843_s27   ;;  %p2662_p10 = scmp.ne.s32.totalorder %s2656_s21, 0 }
  0x76   : > { %s2180_s15 = sshll.u32 %s332_s13, 4  ;;  %s333_s25 = scalar_lea.sflag [#allocation7], %s332_s13 }
  0x77   : > { %s336_s26 = scalar_lea.vmem [#allocation6], %s2180_s15 }
  0x78   : > { %1826 = dma.done.wait (%p2662_p10), %s333_s25, 256  }
  0x79   : > { %1828 = vsyncadd (%p2662_p10), %s333_s25, 4294967040  ;;  %v387_v0 = vld [vmem:[%s2173_s18] sm:$0xff]  ;;  %v388_v1 = vld [vmem:[%s2173_s18 + $0x8] sm:$0xff]  ;;  %s2663_s4 = sld [smem:[#allocation23_spill]]  ;;  %vm421_vm0 = vcmask 130048   ;;  %p381_p7 = scmp.lt.s32.totalorder %s1867_s9, 1  ;;  %v564_v14 = vlaneseq }
  0x7a   : > { %v389_v2 = vpack.c.bf16 %v388_v1, %v387_v0  ;;  %v1886_v12 = vmov 1966171168   ;;  %s2664_s2 = sld [smem:[#allocation21_spill]]  ;;  %vm600_vm1 = vcmask 1040384   ;;  %v1887_v23 = vmov 0   ;;  %s1344_s25 = sshll.u32 %s2167_s22, 7 }
  0x7b   : > { %s382_s21 = scalar_select %p381_p7, %s1867_s9, 1  ;;  %v562_v13 = vunpack.c.l.s4 %v1886_v12  ;;  %v565_v16 = vshrl.u32 %v564_v14, 7  ;;  %639 = vmatprep.mubr.bf16.mxu1 %v1887_v23  ;;  %v1346_v25 = vld [vmem:[%s2613_s5] ss:$0 sm:$0xff]  ;;  %vm575_vm2 = vcmask 15360  }
  0x7c   : > { %399 = vxpose.xlu0.c.b16.start.end [1/1] (short) %v389_v2, 128  ;;  %s2447_s23 = scalar_lea.vmem [#allocation9], %s1344_s25  ;;  %s2665_s19 = sld [smem:[#allocation15_spill]] }
  0x7d   : > { %s1345_s17 = sshll.u32 %s382_s21, 1  ;;  %v563_v15 = vunpack.c.0.s8 %v562_v13  ;;  %s2666_s21 = sld [smem:[#allocation18_spill]] }
  0x7e   : > { %s1390_s7 = sshll.u32 %s1867_s9, 6  ;;  %s1172_s6 = sshll.u32 %s2447_s23, 4  ;;  %s2498_s6 = int_to_ptr.vmem [resolvable:$true] %s1172_s6 }
  0x7f   : > { %v1559_v3 = vld [vmem:[%s2663_s4] sm:$0xff]   ;;  %v566_v19 = vsub.s32 %v563_v15, %v565_v16  ;;  %s2667_s0 = sld [smem:[#allocation25_spill]]  ;;  %s1139_s3 = scalar_lea.sflag [#allocation10], %s2167_s22 }
  0x80   : > { %1421 = vmatprep.subr.bf16.mxu0 %v1559_v3  ;;  %s384_s24 = scalar_lea.vmem %s2664_s2, %s1345_s17  ;;  %s1721_s4 = scalar_lea.vmem %s2498_s6, 2048 }
  0x81   : > { %1422 = vmatpush3.bf16.msra.mxu0 %v1559_v3  ;;  %v1356_v17 = vld.sshfl [vmem:[%s384_s24] sm:$0x11 pattern:$0x75316420]  ;;  %p1722_p11 = scmp.ne.s32.totalorder %s2498_s6, %s1721_s4  ;;  %s1888_s15 = smov [#allocation9]  }
  0x82   : > { %v560_v18 = vcombine.high %v1356_v17, %v1356_v17  ;;  %v567_v21 = vrot.slane %v1356_v17, %v566_v19  ;;  %s1411_s17 = sshll.u32 %s2665_s19, 5 }
  0x83   : > { %s1169_s24 = sadd.s32 %s1411_s17, %s1390_s7  ;;  %p2669_p5 = scmp.ne.s32.totalorder %s2666_s21, 0 }
  0x84   : > { %v574_v20 = vrot.slane %v560_v18, %v566_v19  ;;  %v602_v22 = vsel %vm600_vm1, %v567_v21, 0  ;;  %s1391_s16 = sshll.u32 %s1169_s24, 6 }
  0x85   : > { %s2668_s1 = smov %s2667_s0  ;;  %s2503_s2 = scalar_lea.hbm %s2667_s0, %s1391_s16 }
  0x86   : > { %1357 = vmatprep.subr.msk.bf16.mxu1 %vm600_vm1, %v574_v20  ;;  %p1723_p12 = pnand %p1722_p11, %p2669_p5 }
  0x87   : > { %608 = vmatpush1.bf16.msra.mxu1 %v602_v22 }
  0x88   : > { %p1724_p4 = pneg %p1723_p12 }
  0xe2   : > { %v407_v4 = vpop.trf.xlu0 }
  0xe3   : > { %1423 = vmatprep.mubr.msk.bf16.mxu0 %vm421_vm0, %v407_v4 }
  0xe6   : > { %v408_v5 = vpop.trf.xlu0 }
  0xe7   : > { %1424 = vmatmul.mubr.msk.bf16.vlgmr.msra.gmra.mrb[0].mxu0 %vm421_vm0, %v408_v5 }
  0xea   : > { %v409_v6 = vpop.trf.xlu0 }
  0xeb   : > { %1427 = vmatprep.mubr.msk.bf16.mxu0 %vm421_vm0, %v409_v6 }
  0xee   : > { %v410_v7 = vpop.trf.xlu0 }
  0xef   : > { %1428 = vmatmul.mubr.msk.bf16.gmra.mrb[4].mxu0 %vm421_vm0, %v410_v7 }
  0xf2   : > { %v411_v8 = vpop.trf.xlu0 }
  0xf3   : > { %1431 = vmatprep.mubr.msk.bf16.mxu0 %vm421_vm0, %v411_v8 }
  0xf6   : > { %v412_v9 = vpop.trf.xlu0 }
  0xf7   : > { %1432 = vmatmul.mubr.msk.bf16.gmra.mrb[8].mxu0 %vm421_vm0, %v412_v9 }
  0xfa   : > { %v413_v10 = vpop.trf.xlu0 }
  0xfb   : > { %1435 = vmatprep.mubr.msk.bf16.mxu0 %vm421_vm0, %v413_v10 }
  0xfe   : > { %v414_v11 = vpop.trf.xlu0 }
  0xff   : > { %1436 = vmatmul.mubr.msk.bf16.gmra.mrb[12].mxu0 %vm421_vm0, %v414_v11 }
 0x1ba   : > { %v1425_v24 = vpop.f32.mrb[0].mxu0 }
 0x1bb   : > { %v480_v26 = vpop.f32.mrb[1].mxu0  ;;  %v489_v28 = vadd.f32 %v1425_v24, %v1346_v25 }
 0x1bc   : > { %v1426_v27 = vpop.f32.mrb[2].mxu0  ;;  %v481_v31 = vadd.f32 %v1346_v25, %v480_v26 }
 0x1bd   : > { %v492_v29 = vadd.f32 %v1426_v27, %v1346_v25  ;;  %v483_v30 = vpop.f32.mrb[3].mxu0 }
 0x1be   : > { %v484_v32 = vadd.f32 %v1346_v25, %v483_v30 }
 0x1bf   : > { %v544_v33 = vpack.c.bf16 %v492_v29, %v489_v28 }
 0x1c0   : > { %v543_v34 = vpack.c.bf16 %v484_v32, %v481_v31 }
 0x1c2   : > { %1358 = vmatmul.mubr.msk.bf16.vlgmr.msra.gmra.mrb[0].mxu1 %vm575_vm2, %v543_v34  ;;  %v1429_v35 = vpop.f32.mrb[4].mxu0 }
 0x1c3   : > { %v505_v36 = vadd.f32 %v1429_v35, %v1346_v25  ;;  %v496_v37 = vpop.f32.mrb[5].mxu0  ;;  %649 = vmatprep.mubr.bf16.mxu1 %v1887_v23 }
 0x1c4   : > { %v497_v38 = vadd.f32 %v1346_v25, %v496_v37  ;;  %v1430_v39 = vpop.f32.mrb[6].mxu0 }
 0x1c5   : > { %v508_v40 = vadd.f32 %v1430_v39, %v1346_v25  ;;  %v499_v41 = vpop.f32.mrb[7].mxu0 }
 0x1c6   : > { %v500_v42 = vadd.f32 %v1346_v25, %v499_v41 }
 0x1c7   : > { %v546_v43 = vpack.c.bf16 %v508_v40, %v505_v36 }
 0x1c8   : > { %v545_v44 = vpack.c.bf16 %v500_v42, %v497_v38 }
 0x1ca   : > { %1359 = vmatmul.mubr.msk.bf16.gmra.mrb[4].mxu1 %vm575_vm2, %v544_v33  ;;  %v1433_v45 = vpop.f32.mrb[8].mxu0 }
 0x1cb   : > { %659 = vmatprep.mubr.bf16.mxu1 %v1887_v23  ;;  %v521_v46 = vadd.f32 %v1433_v45, %v1346_v25  ;;  %v512_v47 = vpop.f32.mrb[9].mxu0 }
 0x1cc   : > { %v513_v48 = vadd.f32 %v1346_v25, %v512_v47  ;;  %v1434_v49 = vpop.f32.mrb[10].mxu0 }
 0x1cd   : > { %v524_v50 = vadd.f32 %v1434_v49, %v1346_v25  ;;  %v515_v51 = vpop.f32.mrb[11].mxu0 }
 0x1ce   : > { %v516_v52 = vadd.f32 %v1346_v25, %v515_v51 }
 0x1cf   : > { %v548_v53 = vpack.c.bf16 %v524_v50, %v521_v46 }
 0x1d0   : > { %v547_v54 = vpack.c.bf16 %v516_v52, %v513_v48 }
 0x1d2   : > { %1360 = vmatmul.mubr.msk.bf16.gmra.mrb[8].mxu1 %vm575_vm2, %v545_v44  ;;  %v1437_v55 = vpop.f32.mrb[12].mxu0 }
 0x1d3   : > { %669 = vmatprep.mubr.bf16.mxu1 %v1887_v23  ;;  %v537_v56 = vadd.f32 %v1437_v55, %v1346_v25  ;;  %v528_v57 = vpop.f32.mrb[13].mxu0 }
 0x1d4   : > { %v529_v58 = vadd.f32 %v1346_v25, %v528_v57  ;;  %v1438_v59 = vpop.f32.mrb[14].mxu0 }
 0x1d5   : > { %v540_v60 = vadd.f32 %v1438_v59, %v1346_v25  ;;  %v531_v61 = vpop.f32.mrb[15].mxu0 }
 0x1d6   : > { %v532_v62 = vadd.f32 %v1346_v25, %v531_v61 }
 0x1d7   : > { %v550_v63 = vpack.c.bf16 %v540_v60, %v537_v56 }
 0x1d8   : > { %v549_v0 = vpack.c.bf16 %v532_v62, %v529_v58 }
 0x1da   : > { %1361 = vmatmul.mubr.msk.bf16.gmra.mrb[12].mxu1 %vm575_vm2, %v546_v43 }
 0x1db   : > { %679 = vmatprep.mubr.bf16.mxu1 %v1887_v23 }
 0x1e2   : > { %1362 = vmatmul.mubr.msk.bf16.gmra.mrb[16].mxu1 %vm575_vm2, %v547_v54 }
 0x1e3   : > { %689 = vmatprep.mubr.bf16.mxu1 %v1887_v23 }
 0x1ea   : > { %1363 = vmatmul.mubr.msk.bf16.gmra.mrb[20].mxu1 %vm575_vm2, %v548_v53 }
 0x1eb   : > { %699 = vmatprep.mubr.bf16.mxu1 %v1887_v23 }
 0x1f2   : > { %1364 = vmatmul.mubr.msk.bf16.gmra.mrb[24].mxu1 %vm575_vm2, %v549_v0 }
 0x1f3   : > { %709 = vmatprep.mubr.bf16.mxu1 %v1887_v23 }
 0x1fa   : > { %1365 = vmatmul.mubr.msk.bf16.gmra.mrb[28].mxu1 %vm575_vm2, %v550_v63 }
 0x295   : > { %v2216_v1 = vpop.f32.mrb[0].mxu1 }
 0x296   : > { %v2218_v2 = vpop.f32.mrb[1].mxu1 }
 0x297   : > { %v2220_v3 = vpop.f32.mrb[2].mxu1  ;;  %v720_v4 = vmax.f32 %v2216_v1, %v2218_v2 }
 0x298   : > { %v2224_v5 = vpop.f32.mrb[3].mxu1 }
 0x299   : > { %721 = vmax.xlane.f32.xlu0 %v720_v4  ;;  %v723_v6 = vmax.f32 %v2220_v3, %v2224_v5 }
 0x29b   : > { %724 = vmax.xlane.f32.xlu1 %v723_v6 }
 0x29d   : > { %v2228_v7 = vpop.f32.mrb[4].mxu1 }
 0x29e   : > { %v2230_v8 = vpop.f32.mrb[5].mxu1 }
 0x29f   : > { %v2232_v9 = vpop.f32.mrb[6].mxu1  ;;  %v726_v10 = vmax.f32 %v2228_v7, %v2230_v8 }
 0x2a0   : > { %v2236_v11 = vpop.f32.mrb[7].mxu1 }
 0x2a1   : > { %727 = vmax.xlane.f32.xlu1 %v726_v10  ;;  %v729_v12 = vmax.f32 %v2232_v9, %v2236_v11 }
 0x2a5   : > { %730 = vmax.xlane.f32.xlu1 %v729_v12  ;;  %v2240_v13 = vpop.f32.mrb[8].mxu1 }
 0x2a6   : > { %v2242_v14 = vpop.f32.mrb[9].mxu1 }
 0x2a7   : > { %v2244_v15 = vpop.f32.mrb[10].mxu1  ;;  %v732_v16 = vmax.f32 %v2240_v13, %v2242_v14 }
 0x2a8   : > { %v2248_v17 = vpop.f32.mrb[11].mxu1 }
 0x2a9   : > { %733 = vmax.xlane.f32.xlu1 %v732_v16  ;;  %v735_v18 = vmax.f32 %v2244_v15, %v2248_v17 }
 0x2ad   : > { %736 = vmax.xlane.f32.xlu1 %v735_v18  ;;  %v2252_v19 = vpop.f32.mrb[12].mxu1 }
 0x2ae   : > { %v2254_v20 = vpop.f32.mrb[13].mxu1 }
 0x2af   : > { %v2256_v21 = vpop.f32.mrb[14].mxu1  ;;  %v738_v22 = vmax.f32 %v2252_v19, %v2254_v20 }
 0x2b0   : > { %v2260_v23 = vpop.f32.mrb[15].mxu1 }
 0x2b1   : > { %739 = vmax.xlane.f32.xlu1 %v738_v22  ;;  %v741_v24 = vmax.f32 %v2256_v21, %v2260_v23 }
 0x2b5   : > { %742 = vmax.xlane.f32.xlu1 %v741_v24  ;;  %v2264_v25 = vpop.f32.mrb[16].mxu1 }
 0x2b6   : > { %v2266_v26 = vpop.f32.mrb[17].mxu1 }
 0x2b7   : > { %v2268_v27 = vpop.f32.mrb[18].mxu1  ;;  %v744_v28 = vmax.f32 %v2264_v25, %v2266_v26 }
 0x2b8   : > { %v2272_v29 = vpop.f32.mrb[19].mxu1 }
 0x2b9   : > { %745 = vmax.xlane.f32.xlu1 %v744_v28  ;;  %v747_v30 = vmax.f32 %v2268_v27, %v2272_v29 }
 0x2bd   : > { %748 = vmax.xlane.f32.xlu1 %v747_v30  ;;  %v2276_v31 = vpop.f32.mrb[20].mxu1 }
 0x2be   : > { %v2278_v32 = vpop.f32.mrb[21].mxu1 }
 0x2bf   : > { %v2280_v33 = vpop.f32.mrb[22].mxu1  ;;  %v750_v34 = vmax.f32 %v2276_v31, %v2278_v32 }
 0x2c0   : > { %v2284_v35 = vpop.f32.mrb[23].mxu1 }
 0x2c1   : > { %751 = vmax.xlane.f32.xlu1 %v750_v34  ;;  %v753_v36 = vmax.f32 %v2280_v33, %v2284_v35 }
 0x2c5   : > { %754 = vmax.xlane.f32.xlu1 %v753_v36  ;;  %v2288_v37 = vpop.f32.mrb[24].mxu1 }
 0x2c6   : > { %v2290_v38 = vpop.f32.mrb[25].mxu1 }
 0x2c7   : > { %v2292_v39 = vpop.f32.mrb[26].mxu1  ;;  %v756_v40 = vmax.f32 %v2288_v37, %v2290_v38 }
 0x2c8   : > { %v2296_v41 = vpop.f32.mrb[27].mxu1 }
 0x2c9   : > { %757 = vmax.xlane.f32.xlu1 %v756_v40  ;;  %v759_v42 = vmax.f32 %v2292_v39, %v2296_v41 }
 0x2cb   : > { %760 = vmax.xlane.f32.xlu0 %v759_v42 }
 0x2cd   : > { %v2300_v43 = vpop.f32.mrb[28].mxu1 }
 0x2ce   : > { %v2302_v44 = vpop.f32.mrb[29].mxu1 }
 0x2cf   : > { %v2304_v45 = vpop.f32.mrb[30].mxu1  ;;  %v762_v46 = vmax.f32 %v2300_v43, %v2302_v44 }
 0x2d0   : > { %v2308_v47 = vpop.f32.mrb[31].mxu1 }
 0x2d1   : > { %v765_v48 = vmax.f32 %v2304_v45, %v2308_v47  ;;  %763 = vmax.xlane.f32.xlu1 %v762_v46 }
 0x2d3   : > { %766 = vmax.xlane.f32.xlu0 %v765_v48 }
 0x326   : > { %v722_v49 = vpop.xlane.xlu0 %721 }
 0x327   : > { %v768_v50 = vsub.f32 %v2216_v1, %v722_v49  ;;  %v769_v51 = vsub.f32 %v2218_v2, %v722_v49 }
 0x328   : > { %v725_v52 = vpop.xlane.xlu1 %724 }
 0x329   : > { %v800_v53 = vmul.f32 1.442695, %v768_v50  ;;  %v802_v54 = vmul.f32 1.442695, %v769_v51  ;;  %v770_v55 = vsub.f32 %v2220_v3, %v725_v52  ;;  %v771_v56 = vsub.f32 %v2224_v5, %v725_v52 }
 0x32b   : > { %1563 = vpow2.f32 %v800_v53  ;;  %v804_v57 = vmul.f32 1.442695, %v770_v55  ;;  %v806_v58 = vmul.f32 1.442695, %v771_v56 }
 0x32c   : > { %1565 = vpow2.f32 %v802_v54 }
 0x32d   : > { %1567 = vpow2.f32 %v804_v57 }
 0x32e   : > { %1569 = vpow2.f32 %v806_v58  ;;  %v728_v59 = vpop.xlane.xlu1 %727 }
 0x32f   : > { %v772_v60 = vsub.f32 %v2228_v7, %v728_v59  ;;  %v773_v61 = vsub.f32 %v2230_v8, %v728_v59 }
 0x331   : > { %v808_v62 = vmul.f32 1.442695, %v772_v60  ;;  %v810_v63 = vmul.f32 1.442695, %v773_v61 }
 0x332   : > { %v731_v0 = vpop.xlane.xlu1 %730 }
 0x333   : > { %1571 = vpow2.f32 %v808_v62  ;;  %v774_v1 = vsub.f32 %v2232_v9, %v731_v0  ;;  %v775_v2 = vsub.f32 %v2236_v11, %v731_v0 }
 0x334   : > { %1573 = vpow2.f32 %v810_v63 }
 0x335   : > { %v2320_v3 = vpop.eup %1563  ;;  %v812_v4 = vmul.f32 1.442695, %v774_v1  ;;  %v814_v5 = vmul.f32 1.442695, %v775_v2 }
 0x336   : > { %v2322_v6 = vpop.eup %1565  ;;  %v734_v10 = vpop.xlane.xlu1 %733 }
 0x337   : > { %v2324_v12 = vpop.eup %1567  ;;  %1575 = vpow2.f32 %v812_v4  ;;  %v776_v7 = vsub.f32 %v2240_v13, %v734_v10  ;;  %v777_v8 = vsub.f32 %v2242_v14, %v734_v10  ;;  %v864_v9 = vadd.f32 %v2322_v6, %v2320_v3 }
 0x338   : > { %v2330_v16 = vpop.eup %1569  ;;  %1577 = vpow2.f32 %v814_v5 }
 0x339   : > { %v816_v11 = vmul.f32 1.442695, %v776_v7  ;;  %v818_v18 = vmul.f32 1.442695, %v777_v8  ;;  %865 = vadd.xlane.f32.xlu1 %v864_v9  ;;  %v867_v22 = vadd.f32 %v2330_v16, %v2324_v12 }
 0x33a   : > { %v737_v24 = vpop.xlane.xlu1 %736 }
 0x33b   : > { %1579 = vpow2.f32 %v816_v11  ;;  %v778_v28 = vsub.f32 %v2244_v15, %v737_v24  ;;  %v779_v13 = vsub.f32 %v2248_v17, %v737_v24  ;;  %868 = vadd.xlane.f32.xlu0 %v867_v22 }
 0x33c   : > { %1581 = vpow2.f32 %v818_v18 }
 0x33d   : > { %v2336_v14 = vpop.eup %1571  ;;  %v820_v30 = vmul.f32 1.442695, %v778_v28  ;;  %v822_v34 = vmul.f32 1.442695, %v779_v13 }
 0x33e   : > { %v2338_v36 = vpop.eup %1573  ;;  %v740_v40 = vpop.xlane.xlu1 %739 }
 0x33f   : > { %1583 = vpow2.f32 %v820_v30  ;;  %v780_v42 = vsub.f32 %v2252_v19, %v740_v40  ;;  %v781_v46 = vsub.f32 %v2254_v20, %v740_v40  ;;  %v870_v48 = vadd.f32 %v2338_v36, %v2336_v14 }
 0x340   : > { %1585 = vpow2.f32 %v822_v34 }
 0x341   : > { %v2344_v15 = vpop.eup %1575  ;;  %v824_v17 = vmul.f32 1.442695, %v780_v42  ;;  %v826_v49 = vmul.f32 1.442695, %v781_v46  ;;  %871 = vadd.xlane.f32.xlu1 %v870_v48 }
 0x342   : > { %v2346_v50 = vpop.eup %1577  ;;  %v743_v51 = vpop.xlane.xlu1 %742 }
 0x343   : > { %1587 = vpow2.f32 %v824_v17  ;;  %v782_v52 = vsub.f32 %v2256_v21, %v743_v51  ;;  %v783_v53 = vsub.f32 %v2260_v23, %v743_v51  ;;  %v873_v19 = vadd.f32 %v2346_v50, %v2344_v15 }
 0x344   : > { %1589 = vpow2.f32 %v826_v49 }
 0x345   : > { %v2352_v20 = vpop.eup %1579  ;;  %v828_v54 = vmul.f32 1.442695, %v782_v52  ;;  %v830_v55 = vmul.f32 1.442695, %v783_v53  ;;  %874 = vadd.xlane.f32.xlu0 %v873_v19 }
 0x346   : > { %v2354_v56 = vpop.eup %1581  ;;  %v746_v57 = vpop.xlane.xlu1 %745 }
 0x347   : > { %1591 = vpow2.f32 %v828_v54  ;;  %v784_v58 = vsub.f32 %v2264_v25, %v746_v57  ;;  %v785_v59 = vsub.f32 %v2266_v26, %v746_v57  ;;  %v876_v21 = vadd.f32 %v2354_v56, %v2352_v20 }
 0x348   : > { %1593 = vpow2.f32 %v830_v55 }
 0x349   : > { %v2360_v23 = vpop.eup %1583  ;;  %v832_v60 = vmul.f32 1.442695, %v784_v58  ;;  %v834_v61 = vmul.f32 1.442695, %v785_v59  ;;  %877 = vadd.xlane.f32.xlu1 %v876_v21 }
 0x34a   : > { %v2362_v62 = vpop.eup %1585  ;;  %v749_v63 = vpop.xlane.xlu1 %748 }
 0x34b   : > { %1595 = vpow2.f32 %v832_v60  ;;  %v786_v0 = vsub.f32 %v2268_v27, %v749_v63  ;;  %v787_v1 = vsub.f32 %v2272_v29, %v749_v63  ;;  %v879_v25 = vadd.f32 %v2362_v62, %v2360_v23 }
 0x34c   : > { %1597 = vpow2.f32 %v834_v61 }
 0x34d   : > { %v2368_v26 = vpop.eup %1587  ;;  %v836_v2 = vmul.f32 1.442695, %v786_v0  ;;  %v838_v4 = vmul.f32 1.442695, %v787_v1  ;;  %880 = vadd.xlane.f32.xlu0 %v879_v25 }
 0x34e   : > { %v2370_v5 = vpop.eup %1589  ;;  %v752_v10 = vpop.xlane.xlu1 %751 }
 0x34f   : > { %1599 = vpow2.f32 %v836_v2  ;;  %v788_v7 = vsub.f32 %v2276_v31, %v752_v10  ;;  %v789_v8 = vsub.f32 %v2278_v32, %v752_v10  ;;  %v882_v27 = vadd.f32 %v2370_v5, %v2368_v26 }
 0x350   : > { %1601 = vpow2.f32 %v838_v4 }
 0x351   : > { %v2376_v29 = vpop.eup %1591  ;;  %v840_v9 = vmul.f32 1.442695, %v788_v7  ;;  %v842_v11 = vmul.f32 1.442695, %v789_v8  ;;  %883 = vadd.xlane.f32.xlu1 %v882_v27 }
 0x352   : > { %v2378_v18 = vpop.eup %1593  ;;  %v755_v22 = vpop.xlane.xlu1 %754 }
 0x353   : > { %1603 = vpow2.f32 %v840_v9  ;;  %v790_v24 = vsub.f32 %v2280_v33, %v755_v22  ;;  %v791_v28 = vsub.f32 %v2284_v35, %v755_v22  ;;  %v885_v31 = vadd.f32 %v2378_v18, %v2376_v29 }
 0x354   : > { %1605 = vpow2.f32 %v842_v11 }
 0x355   : > { %v2384_v32 = vpop.eup %1595  ;;  %v844_v13 = vmul.f32 1.442695, %v790_v24  ;;  %v846_v30 = vmul.f32 1.442695, %v791_v28  ;;  %886 = vadd.xlane.f32.xlu0 %v885_v31  ;;  %v1562_v28 = vld [vmem:[%s336_s26 + $0x4] ss:$8 sps:$4 sm:$0xff]  }
 0x356   : > { %v2386_v34 = vpop.eup %1597  ;;  %v758_v40 = vpop.xlane.xlu1 %757  ;;  %1116 = vmatprep.mubr.bf16.mxu0 %v1562_v28 }
 0x357   : > { %1607 = vpow2.f32 %v844_v13  ;;  %v792_v42 = vsub.f32 %v2288_v37, %v758_v40  ;;  %v793_v46 = vsub.f32 %v2290_v38, %v758_v40  ;;  %v888_v33 = vadd.f32 %v2386_v34, %v2384_v32 }
 0x358   : > { %1609 = vpow2.f32 %v846_v30  ;;  %v761_v35 = vpop.xlane.xlu0 %760 }
 0x359   : > { %v2392_v48 = vpop.eup %1599  ;;  %v848_v17 = vmul.f32 1.442695, %v792_v42  ;;  %v850_v49 = vmul.f32 1.442695, %v793_v46  ;;  %889 = vadd.xlane.f32.xlu1 %v888_v33  ;;  %v794_v51 = vsub.f32 %v2292_v39, %v761_v35  ;;  %v795_v52 = vsub.f32 %v2296_v41, %v761_v35 }
 0x35a   : > { %v2396_v53 = vpop.eup %1601 }
 0x35b   : > { %1611 = vpow2.f32 %v848_v17  ;;  %v852_v37 = vmul.f32 1.442695, %v794_v51  ;;  %v854_v19 = vmul.f32 1.442695, %v795_v52  ;;  %v891_v38 = vadd.f32 %v2396_v53, %v2392_v48 }
 0x35c   : > { %1613 = vpow2.f32 %v850_v49 }
 0x35d   : > { %v2400_v54 = vpop.eup %1603  ;;  %1615 = vpow2.f32 %v852_v37  ;;  %892 = vadd.xlane.f32.xlu0 %v891_v38 }
 0x35e   : > { %v2402_v55 = vpop.eup %1605  ;;  %1617 = vpow2.f32 %v854_v19  ;;  %v764_v57 = vpop.xlane.xlu1 %763 }
 0x35f   : > { %v796_v39 = vsub.f32 %v2300_v43, %v764_v57  ;;  %v797_v41 = vsub.f32 %v2302_v44, %v764_v57  ;;  %v894_v58 = vadd.f32 %v2402_v55, %v2400_v54 }
 0x360   : > { %v767_v59 = vpop.xlane.xlu0 %766 }
 0x361   : > { %v2408_v21 = vpop.eup %1607  ;;  %v856_v60 = vmul.f32 1.442695, %v796_v39  ;;  %v858_v61 = vmul.f32 1.442695, %v797_v41  ;;  %895 = vadd.xlane.f32.xlu1 %v894_v58  ;;  %v798_v63 = vsub.f32 %v2304_v45, %v767_v59  ;;  %v799_v0 = vsub.f32 %v2308_v47, %v767_v59 }
 0x362   : > { %v2412_v1 = vpop.eup %1609 }
 0x363   : > { %1619 = vpow2.f32 %v856_v60  ;;  %v860_v25 = vmul.f32 1.442695, %v798_v63  ;;  %v862_v43 = vmul.f32 1.442695, %v799_v0  ;;  %v897_v44 = vadd.f32 %v2412_v1, %v2408_v21 }
 0x364   : > { %1621 = vpow2.f32 %v858_v61 }
 0x365   : > { %v2416_v2 = vpop.eup %1611  ;;  %1623 = vpow2.f32 %v860_v25  ;;  %898 = vadd.xlane.f32.xlu0 %v897_v44 }
 0x366   : > { %v2418_v4 = vpop.eup %1613  ;;  %1625 = vpow2.f32 %v862_v43 }
 0x367   : > { %v2420_v45 = vpop.eup %1615  ;;  %v900_v47 = vadd.f32 %v2418_v4, %v2416_v2 }
 0x368   : > { %v2424_v10 = vpop.eup %1617 }
 0x369   : > { %901 = vadd.xlane.f32.xlu1 %v900_v47  ;;  %v903_v7 = vadd.f32 %v2424_v10, %v2420_v45 }
 0x36b   : > { %904 = vadd.xlane.f32.xlu0 %v903_v7 }
 0x36d   : > { %v2428_v8 = vpop.eup %1619 }
 0x36e   : > { %v2430_v27 = vpop.eup %1621 }
 0x36f   : > { %v2432_v9 = vpop.eup %1623  ;;  %v906_v11 = vadd.f32 %v2430_v27, %v2428_v8 }
 0x370   : > { %v2436_v22 = vpop.eup %1625 }
 0x371   : > { %907 = vadd.xlane.f32.xlu1 %v906_v11  ;;  %v909_v24 = vadd.f32 %v2436_v22, %v2432_v9 }
 0x373   : > { %910 = vadd.xlane.f32.xlu0 %v909_v24 }
 0x3c6   : > { %v866_v31 = vpop.xlane.xlu1 %865 }
 0x3c7   : > { %1627 = vrcp.f32 %v866_v31 }
 0x3c8   : > { %v869_v13 = vpop.xlane.xlu0 %868 }
 0x3c9   : > { %1629 = vrcp.f32 %v869_v13 }
 0x3ce   : > { %v872_v30 = vpop.xlane.xlu1 %871 }
 0x3cf   : > { %1631 = vrcp.f32 %v872_v30 }
 0x3d1   : > { %v1628_v40 = vpop.eup %1627 }
 0x3d2   : > { %v875_v42 = vpop.xlane.xlu0 %874  ;;  %v928_v46 = vmul.f32 %v1628_v40, %v2320_v3  ;;  %v929_v33 = vmul.f32 %v1628_v40, %v2322_v6 }
 0x3d3   : > { %v1630_v35 = vpop.eup %1629  ;;  %1633 = vrcp.f32 %v875_v42 }
 0x3d4   : > { %v930_v17 = vmul.f32 %v1630_v35, %v2324_v12  ;;  %v931_v49 = vmul.f32 %v1630_v35, %v2330_v16  ;;  %v1395_v51 = vpack.c.bf16 %v929_v33, %v928_v46 }
 0x3d6   : > { %v878_v52 = vpop.xlane.xlu1 %877  ;;  %v961_v37 = vpack.c.bf16 %v931_v49, %v929_v33  ;;  %v1396_v19 = vpack.c.bf16 %v931_v49, %v930_v17  ;;  %1056 = vst [vmem:[%s2447_s23] sm:$0xff] %v1395_v51  ;;  %v960_v38 = vpack.c.bf16 %v930_v17, %v928_v46 }
 0x3d7   : > { %1635 = vrcp.f32 %v878_v52 }
 0x3d8   : > { %1057 = vst [vmem:[%s2447_s23 + $0x8] sm:$0xff] %v1396_v19  ;;  %1084 = vmatprep.subr.bf16.mxu0 %v961_v37 }
 0x3d9   : > { %v1632_v3 = vpop.eup %1631  ;;  %1085 = vmatpush1.bf16.xpose.msra.mxu0 %v960_v38 }
 0x3da   : > { %v881_v6 = vpop.xlane.xlu0 %880  ;;  %v932_v12 = vmul.f32 %v1632_v3, %v2336_v14  ;;  %v933_v16 = vmul.f32 %v1632_v3, %v2338_v36 }
 0x3db   : > { %1637 = vrcp.f32 %v881_v6 }
 0x3dc   : > { %v1397_v57 = vpack.c.bf16 %v933_v16, %v932_v12 }
 0x3dd   : > { %v1634_v39 = vpop.eup %1633 }
 0x3de   : > { %v884_v41 = vpop.xlane.xlu1 %883  ;;  %v934_v58 = vmul.f32 %v1634_v39, %v2344_v15  ;;  %v935_v59 = vmul.f32 %v1634_v39, %v2346_v50  ;;  %1058 = vst [vmem:[%s2447_s23 + $0x10] sm:$0xff] %v1397_v57 }
 0x3df   : > { %1639 = vrcp.f32 %v884_v41 }
 0x3e0   : > { %v963_v60 = vpack.c.bf16 %v935_v59, %v933_v16  ;;  %v1398_v61 = vpack.c.bf16 %v935_v59, %v934_v58  ;;  %v962_v63 = vpack.c.bf16 %v934_v58, %v932_v12 }
 0x3e1   : > { %v1636_v0 = vpop.eup %1635 }
 0x3e2   : > { %1059 = vst [vmem:[%s2447_s23 + $0x18] sm:$0xff] %v1398_v61  ;;  %1086 = vmatprep.subr.bf16.mxu0 %v963_v60  ;;  %v887_v14 = vpop.xlane.xlu0 %886  ;;  %v936_v36 = vmul.f32 %v1636_v0, %v2352_v20  ;;  %v937_v25 = vmul.f32 %v1636_v0, %v2354_v56 }
 0x3e3   : > { %1641 = vrcp.f32 %v887_v14  ;;  %1087 = vmatpush1.bf16.xpose.msra.mxu0 %v962_v63 }
 0x3e4   : > { %v1399_v15 = vpack.c.bf16 %v937_v25, %v936_v36 }
 0x3e5   : > { %v1638_v43 = vpop.eup %1637 }
 0x3e6   : > { %v890_v50 = vpop.xlane.xlu1 %889  ;;  %v938_v44 = vmul.f32 %v1638_v43, %v2360_v23  ;;  %v939_v47 = vmul.f32 %v1638_v43, %v2362_v62  ;;  %1060 = vst [vmem:[%s2447_s23 + $0x20] sm:$0xff] %v1399_v15 }
 0x3e7   : > { %1643 = vrcp.f32 %v890_v50 }
 0x3e8   : > { %v965_v7 = vpack.c.bf16 %v939_v47, %v937_v25  ;;  %v1400_v11 = vpack.c.bf16 %v939_v47, %v938_v44  ;;  %v964_v24 = vpack.c.bf16 %v938_v44, %v936_v36 }
 0x3e9   : > { %v1640_v28 = vpop.eup %1639 }
 0x3ea   : > { %1061 = vst [vmem:[%s2447_s23 + $0x28] sm:$0xff] %v1400_v11  ;;  %1088 = vmatprep.subr.bf16.mxu0 %v965_v7  ;;  %v893_v20 = vpop.xlane.xlu0 %892  ;;  %v940_v56 = vmul.f32 %v1640_v28, %v2368_v26  ;;  %v941_v31 = vmul.f32 %v1640_v28, %v2370_v5 }
 0x3eb   : > { %1645 = vrcp.f32 %v893_v20  ;;  %1089 = vmatpush1.bf16.xpose.msra.mxu0 %v964_v24 }
 0x3ec   : > { %v1401_v23 = vpack.c.bf16 %v941_v31, %v940_v56 }
 0x3ed   : > { %v1642_v13 = vpop.eup %1641 }
 0x3ee   : > { %v896_v62 = vpop.xlane.xlu1 %895  ;;  %v942_v30 = vmul.f32 %v1642_v13, %v2376_v29  ;;  %v943_v40 = vmul.f32 %v1642_v13, %v2378_v18  ;;  %1062 = vst [vmem:[%s2447_s23 + $0x30] sm:$0xff] %v1401_v23 }
 0x3ef   : > { %1647 = vrcp.f32 %v896_v62 }
 0x3f0   : > { %v967_v42 = vpack.c.bf16 %v943_v40, %v941_v31  ;;  %v1402_v46 = vpack.c.bf16 %v943_v40, %v942_v30  ;;  %v966_v33 = vpack.c.bf16 %v942_v30, %v940_v56 }
 0x3f1   : > { %v1644_v35 = vpop.eup %1643 }
 0x3f2   : > { %1063 = vst [vmem:[%s2447_s23 + $0x38] sm:$0xff] %v1402_v46  ;;  %1090 = vmatprep.subr.bf16.mxu0 %v967_v42  ;;  %v899_v26 = vpop.xlane.xlu0 %898  ;;  %v944_v5 = vmul.f32 %v1644_v35, %v2384_v32  ;;  %v945_v17 = vmul.f32 %v1644_v35, %v2386_v34 }
 0x3f3   : > { %1649 = vrcp.f32 %v899_v26  ;;  %1091 = vmatpush1.bf16.xpose.msra.mxu0 %v966_v33 }
 0x3f4   : > { %v1403_v29 = vpack.c.bf16 %v945_v17, %v944_v5 }
 0x3f5   : > { %v1646_v49 = vpop.eup %1645 }
 0x3f6   : > { %v902_v18 = vpop.xlane.xlu1 %901  ;;  %v946_v51 = vmul.f32 %v1646_v49, %v2392_v48  ;;  %v947_v52 = vmul.f32 %v1646_v49, %v2396_v53  ;;  %1064 = vst [vmem:[%s2447_s23 + $0x40] sm:$0xff] %v1403_v29 }
 0x3f7   : > { %1651 = vrcp.f32 %v902_v18 }
 0x3f8   : > { %v905_v37 = vpop.xlane.xlu0 %904  ;;  %v969_v19 = vpack.c.bf16 %v947_v52, %v945_v17  ;;  %v1404_v38 = vpack.c.bf16 %v947_v52, %v946_v51  ;;  %v968_v3 = vpack.c.bf16 %v946_v51, %v944_v5 }
 0x3f9   : > { %v1648_v32 = vpop.eup %1647  ;;  %1653 = vrcp.f32 %v905_v37 }
 0x3fa   : > { %1065 = vst [vmem:[%s2447_s23 + $0x48] sm:$0xff] %v1404_v38  ;;  %1092 = vmatprep.subr.bf16.mxu0 %v969_v19  ;;  %v948_v34 = vmul.f32 %v1648_v32, %v2400_v54  ;;  %v949_v6 = vmul.f32 %v1648_v32, %v2402_v55 }
 0x3fb   : > { %1093 = vmatpush1.bf16.xpose.msra.mxu0 %v968_v3 }
 0x3fc   : > { %v1405_v48 = vpack.c.bf16 %v949_v6, %v948_v34 }
 0x3fd   : > { %v1650_v12 = vpop.eup %1649 }
 0x3fe   : > { %v908_v53 = vpop.xlane.xlu1 %907  ;;  %v950_v16 = vmul.f32 %v1650_v12, %v2408_v21  ;;  %v951_v57 = vmul.f32 %v1650_v12, %v2412_v1  ;;  %1066 = vst [vmem:[%s2447_s23 + $0x50] sm:$0xff] %v1405_v48 }
 0x3ff   : > { %1655 = vrcp.f32 %v908_v53 }
 0x400   : > { %v911_v39 = vpop.xlane.xlu0 %910  ;;  %v971_v41 = vpack.c.bf16 %v951_v57, %v949_v6  ;;  %v1406_v58 = vpack.c.bf16 %v951_v57, %v950_v16  ;;  %v970_v59 = vpack.c.bf16 %v950_v16, %v948_v34 }
 0x401   : > { %v1652_v54 = vpop.eup %1651  ;;  %1657 = vrcp.f32 %v911_v39 }
 0x402   : > { %1067 = vst [vmem:[%s2447_s23 + $0x58] sm:$0xff] %v1406_v58  ;;  %1094 = vmatprep.subr.bf16.mxu0 %v971_v41  ;;  %v952_v55 = vmul.f32 %v1652_v54, %v2416_v2  ;;  %v953_v60 = vmul.f32 %v1652_v54, %v2418_v4 }
 0x403   : > { %v1654_v61 = vpop.eup %1653  ;;  %1095 = vmatpush1.bf16.xpose.msra.mxu0 %v970_v59 }
 0x404   : > { %v954_v21 = vmul.f32 %v1654_v61, %v2420_v45  ;;  %v955_v1 = vmul.f32 %v1654_v61, %v2424_v10  ;;  %v1407_v63 = vpack.c.bf16 %v953_v60, %v952_v55 }
 0x406   : > { %v973_v0 = vpack.c.bf16 %v955_v1, %v953_v60  ;;  %v1408_v14 = vpack.c.bf16 %v955_v1, %v954_v21  ;;  %1068 = vst [vmem:[%s2447_s23 + $0x60] sm:$0xff] %v1407_v63  ;;  %v972_v25 = vpack.c.bf16 %v954_v21, %v952_v55 }
 0x408   : > { %1069 = vst [vmem:[%s2447_s23 + $0x68] sm:$0xff] %v1408_v14  ;;  %1096 = vmatprep.subr.bf16.mxu0 %v973_v0 }
 0x409   : > { %v1656_v36 = vpop.eup %1655 }
 0x40a   : > { %v956_v2 = vmul.f32 %v1656_v36, %v2428_v8  ;;  %v957_v4 = vmul.f32 %v1656_v36, %v2430_v27  ;;  %v1560_v27 = vld [vmem:[%s336_s26] ss:$8 sps:$4 sm:$0xff]   ;;  %s1725_s26 = sshll.u32 %s1888_s15, 4  ;;  %s1726_s26 = int_to_ptr.vmem [resolvable:$false] %s1725_s26 }
 0x40b   : > { %v1658_v45 = vpop.eup %1657  ;;  %1097 = vmatpush1.bf16.xpose.msra.mxu0 %v972_v25  ;;  %p1728_p3 = scmp.lt.s32.totalorder %s2498_s6, %s1726_s26 }
 0x40c   : > { %v958_v10 = vmul.f32 %v1658_v45, %v2432_v9  ;;  %v959_v15 = vmul.f32 %v1658_v45, %v2436_v22  ;;  %v1409_v43 = vpack.c.bf16 %v957_v4, %v956_v2 }
 0x40e   : > { %v975_v50 = vpack.c.bf16 %v959_v15, %v957_v4  ;;  %v1410_v44 = vpack.c.bf16 %v959_v15, %v958_v10  ;;  %1070 = vst [vmem:[%s2447_s23 + $0x70] sm:$0xff] %v1409_v43  ;;  %v974_v8 = vpack.c.bf16 %v958_v10, %v956_v2 }
 0x410   : > { %1071 = vst [vmem:[%s2447_s23 + $0x78] sm:$0xff] %v1410_v44  ;;  %1098 = vmatprep.subr.bf16.mxu0 %v975_v50  ;;  %s1727_s23 = scalar_lea.vmem %s1726_s26, 4096 }
 0x411   : > { %p1729_p2 = scmp.lt.s32.totalorder %s1727_s23, %s1721_s4 }
 0x413   : > { %1099 = vmatpush1.bf16.xpose.msra.mxu0 %v974_v8  ;;  %p1730_p9 = por %p1729_p2, %p1728_p3 }
 0x415   : > { %p1731_p0 = pnand %p1730_p9, %p1724_p4 }
 0x41a   : > { %1117 = vmatmul.mubr.bf16.vlgmr.msra.gmra.mrb[16].mxu0 %v1560_v27 }
 0x41b   : > { %1734 = shalt.err (!%p1731_p0)
}
 0x41c   : > { %s1735_s0 = scalar_lea.hbm %s2503_s2, 2048  ;;  %s1739_s24 = scalar_lea.hbm %s2668_s1, 8192 }
 0x41d   : > { %p1736_p1 = scmp.ne.s32.totalorder %s2503_s2, %s1735_s0  ;;  %p1740_p8 = scmp.lt.u32.totalorder %s2503_s2, %s2668_s1 }
 0x41e   : > { %p1741_p10 = scmp.lt.u32.totalorder %s1739_s24, %s1735_s0  ;;  %p1743_p11 = scmp.lt.u32.totalorder %s1735_s0, %s2503_s2 }
 0x41f   : > { %p1737_p13 = pnand %p1736_p1, %p2669_p5 }
 0x420   : > { %p1742_p7 = por %p1741_p10, %p1740_p8 }
 0x421   : > { %p1738_p6 = pneg %p1737_p13 }
 0x422   : > { %p1744_p12 = por %p1743_p11, %p1742_p7 }
 0x424   : > { %p1745_p4 = pnand %p1744_p12, %p1738_p6 }
 0x426   : > { %1748 = shalt.err (!%p1745_p4)
}
 0x427   : > { %s1889_s4 = smov 128   ;;  %s1890_s25 = smov 8   ;;  %v1659_v24 = vld [vmem:[%s2173_s18] sm:$0xff]  ;;  %v1660_v31 = vld [vmem:[%s2173_s18 + $0x8] sm:$0xff] }
 0x428   : > { %1444 = dma.vmem_to_hbm [thread:$0]  (%p2669_p5), %s2498_s6, 2048, %s2503_s2, %s1139_s3, %s1889_s4, %s1889_s4, %s1890_s25  }
 0x429   : > { %s1125_s15 = sld [smem:[#allocation2]]  ;;  %s1386_s26 = sshll.u32 %s1867_s9, 2 }
 0x42a   : > { %s1150_s23 = sadd.s32 %s2665_s19, %s1386_s26  ;;  %s2670_s0 = sshll.u32 %s2167_s22, 4 }
 0x42b   : > { %s373_s17 = scalar_lea.vmem [#allocation8], %s2670_s0  ;;  %s1387_s24 = sshll.u32 %s1150_s23, 7 }
 0x42c   : > { %s1153_s7 = sshll.u32 %s373_s17, 4  ;;  %s2671_s9 = sld [smem:[#allocation24_spill]]  ;;  %s2537_s7 = int_to_ptr.vmem [resolvable:$true] %s1153_s7 }
 0x42d   : > { %s1134_s16 = scalar_lea.sflag [#allocation5], %s2167_s22  ;;  %s1749_s13 = scalar_lea.vmem %s2537_s7, 256 }
 0x42e   : > { %p1750_p3 = scmp.ne.s32.totalorder %s2537_s7, %s1749_s13 }
 0x42f   : > { %v1126_v9 = vstv %s1125_s15  ;;  %s1891_s15 = smov [#allocation8]  }
 0x430   : > { %p1751_p2 = pnand %p1750_p3, %p2669_p5  ;;  %s1753_s26 = sshll.u32 %s1891_s15, 4  ;;  %s1754_s26 = int_to_ptr.vmem [resolvable:$false] %s1753_s26 }
 0x431   : > { %s1755_s23 = scalar_lea.vmem %s1754_s26, 512  ;;  %p1756_p0 = scmp.lt.s32.totalorder %s2537_s7, %s1754_s26 }
 0x432   : > { %s2672_s19 = smov %s2671_s9  ;;  %s2543_s6 = scalar_lea.hbm %s2671_s9, %s1387_s24 }
 0x433   : > { %p1752_p9 = pneg %p1751_p2  ;;  %p1757_p1 = scmp.lt.s32.totalorder %s1755_s23, %s1749_s13 }
 0x435   : > { %p1758_p13 = por %p1757_p1, %p1756_p0 }
 0x437   : > { %p1759_p6 = pnand %p1758_p13, %p1752_p9 }
 0x4ed   : > { %v1118_v22 = vpop.f32.mrb[16].mxu0 }
 0x4ee   : > { %v1127_v47 = vmul.f32 %v1126_v9, %v1118_v22  ;;  %v1120_v7 = vpop.f32.mrb[17].mxu0 }
 0x4ef   : > { %v1121_v11 = vpop.f32.mrb[18].mxu0 }
 0x4f0   : > { %v1129_v28 = vadd.f32 %v1659_v24, %v1127_v47  ;;  %v1128_v20 = vmul.f32 %v1126_v9, %v1121_v11  ;;  %v1123_v56 = vpop.f32.mrb[19].mxu0 }
 0x4f2   : > { %1131 = vst [vmem:[%s373_s17] sm:$0xff] %v1129_v28  ;;  %v1130_v23 = vadd.f32 %v1660_v31, %v1128_v20 }
 0x4f4   : > { %1132 = vst [vmem:[%s373_s17 + $0x8] sm:$0xff] %v1130_v23 }
 0x4f5   : > { %1762 = shalt.err (!%p1759_p6)
}
 0x4f6   : > { %s1763_s18 = scalar_lea.hbm %s2543_s6, 256  ;;  %s1767_s24 = scalar_lea.hbm %s2672_s19, 1024 }
 0x4f7   : > { %p1764_p8 = scmp.ne.s32.totalorder %s2543_s6, %s1763_s18  ;;  %p1768_p11 = scmp.lt.u32.totalorder %s2543_s6, %s2672_s19 }
 0x4f8   : > { %p1769_p12 = scmp.lt.u32.totalorder %s1767_s24, %s1763_s18  ;;  %p1771_p3 = scmp.lt.u32.totalorder %s1763_s18, %s2543_s6 }
 0x4f9   : > { %p1765_p10 = pnand %p1764_p8, %p2669_p5 }
 0x4fa   : > { %p1770_p4 = por %p1769_p12, %p1768_p11 }
 0x4fb   : > { %p1766_p7 = pneg %p1765_p10 }
 0x4fc   : > { %p1772_p2 = por %p1771_p3, %p1770_p4 }
 0x4fe   : > { %p1773_p9 = pnand %p1772_p2, %p1766_p7 }
 0x500   : > { %1776 = shalt.err (!%p1773_p9)
}
 0x501   : > { %s1892_s9 = smov 256  }
 0x502   : > { %1443 = dma.vmem_to_hbm [thread:$0]  (%p2669_p5), %s2537_s7, 256, %s2543_s6, %s1134_s16, %s1889_s4, %s1892_s9, %s1890_s25  }
 0x503 PF: > { %s2673_s13 = sld [smem:[#allocation19_spill]]  ;;  %p1462_p0 = scmp.ge.s32.totalorder %s1879_s12, 2 }
 0x504   : > { %s1187_s15 = sand.u32 1, %s1851_s29  }
 0x505   : > { %s1188_s26 = scalar_lea.sflag [#allocation5], %s1187_s15 }
 0x509   : > { %p2674_p1 = scmp.ne.s32.totalorder %s2673_s13, 0 }
 0x50b   : > { %p1455_p13 = pnand %p1462_p0, %p2674_p1 }
 0x50d   : > { %1830 = dma.done.wait (!%p1455_p13), %s1188_s26, 256  }
 0x50e   : > { %1832 = vsyncadd (!%p1455_p13), %s1188_s26, 4294967040  ;;  %s1197_s23 = scalar_lea.sflag [#allocation10], %s1187_s15 }
 0x50f   : > { %1834 = dma.done.wait (!%p1455_p13), %s1197_s23, 2048  }
 0x510   : > { %1836 = vsyncadd (!%p1455_p13), %s1197_s23, 4294965248  ;;  %s31_s12 = sadd.s32 1, %s1879_s12   ;;  %s2675_s22 = sld [smem:[#allocation16_spill]] }
 0x511   : > { %p28_p6 = scmp.ge.s32.totalorder %s31_s12, 6   ;;  %s2676_s21 = sld [smem:[#allocation17_spill]] }
 0x512   : > { %s2677_s26 = smov %s1843_s27  ;;  %s2678_s27 = smov %s1847_s28 }
 0x513   : > { %s2679_s28 = smov %s2099_s20  ;;  %s2680_s29 = smov %s1855_s30 }
 0x514   : > { %s2681_s30 = smov %s1859_s8  ;;  %s2682_s8 = smov %s2037_s14 }
 0x515   : > { %s2683_s0 = smov %s1871_s10  ;;  %s2684_s9 = smov %s1875_s11 }
 0x516   : > { %s2685_s10 = smov %s2675_s22  ;;  %30 = sbr.rel (!%p28_p6) target bundleno = 21 (0x15), region = 122 }
 0x517   : > { %s2686_s11 = smov %s2676_s21 }
 0x51d   :  { %1202 = vsyncpa [#allocation4], 1 }
 0x51e   :  { %1204 = vsyncpa [#allocation4 + $0x1], 1 }
 0x51f   :  { %1205 = vsyncpa [#allocation7], 1 }
 0x520   :  { %1207 = vsyncpa [#allocation7 + $0x1], 1 }
 0x521   :  { %1208 = vsyncpa [#allocation5], 1 }
 0x522   :  { %1210 = vsyncpa [#allocation5 + $0x1], 1 }
 0x523   :  { %1211 = vsyncpa [#allocation10], 1 }
 0x524   :  { %1213 = vsyncpa [#allocation10 + $0x1], 1 }

</bundles_post_ra>
